<compile_context>
chip_gen: v7x
topology: tpu7x:2x2x1
jax: 0.10.0
libtpu: 0.0.40
codegen_flags: <defaults>
</compile_context>

<pallas_src>
import jax
import jax.numpy as jnp
from jax.experimental import pallas as pl
from jax.experimental.pallas import tpu as pltpu


def _round_up(a, b):
    return pl.cdiv(a, b) * b


def _choose_tm(n_pad, tm_max):
    """Largest row tile that (a) divides n_pad, (b) is a multiple of 8,
    (c) is <= tm_max, and (d) leaves >= 2 grid steps when n_pad >= 16
    (so v7x's two TensorCores both get row tiles)."""
    if n_pad <= 8:
        return n_pad
    cap = min(tm_max, n_pad // 2)
    cap = max(8, (cap // 8) * 8)
    best = 8
    for cand in range(8, cap + 1, 8):
        if n_pad % cand == 0:
            best = cand
    return best


def _predictor_kernel(x_ref, w_ref, b_ref, cls_ref, bbox_ref):
    """Fused bf16 matmul with f32 accumulate + f32 bias, split into two
    lane-padded outputs.  The split at nc_pad is a 128-lane-aligned slice."""
    acc = jnp.dot(x_ref[...], w_ref[...], preferred_element_type=jnp.float32)
    acc = acc + b_ref[...]
    nc_pad = cls_ref.shape[-1]
    cls_ref[...] = acc[:, :nc_pad]
    bbox_ref[...] = acc[:, nc_pad:]


def prepare_fused_params(w_cls, b_cls, w_bbox, b_bbox, *, param_dtype=jnp.bfloat16):
    """Hoisted (call-once) parameter prep: pack both heads' weights into one
    lane-padded (C, nc_pad + nb_pad) bf16 matrix and one f32 bias row.

    w_cls: (C, num_classes); w_bbox: (C, 4 * num_bbox_reg_classes).
    (These are the transposes of the PyTorch nn.Linear weights.)
    """
    c, nc = w_cls.shape
    cb, nb = w_bbox.shape
    assert c == cb, "cls and bbox heads must share the input feature dim"
    nc_pad = _round_up(nc, 128)
    nb_pad = _round_up(nb, 128)
    out_pad = nc_pad + nb_pad

    # Zero padding -> padded output columns are exactly zero (bias 0 there too).
    w = jnp.zeros((c, out_pad), dtype=param_dtype)
    w = w.at[:, :nc].set(w_cls.astype(param_dtype))
    w = w.at[:, nc_pad:nc_pad + nb].set(w_bbox.astype(param_dtype))

    b = jnp.zeros((1, out_pad), dtype=jnp.float32)
    b = b.at[0, :nc].set(b_cls.astype(jnp.float32))
    b = b.at[0, nc_pad:nc_pad + nb].set(b_bbox.astype(jnp.float32))
    return w, b, nc, nb


def fast_rcnn_predictor_fused(x, w_fused, b_fused, nc, nb, *, tm_max=512,
                              return_padded=False):
    """x: (N, C) ROI features.  w_fused/b_fused from prepare_fused_params.

    Returns (cls_logit (N, nc), bbox_pred (N, nb)) in f32.  With
    return_padded=True, returns the lane-padded (N_pad, nc_pad) / (N_pad, nb_pad)
    kernel outputs directly so downstream ops can consume column offsets
    without an extra XLA slice copy.
    """
    n, c = x.shape
    out_pad = w_fused.shape[1]
    nc_pad = _round_up(nc, 128)
    nb_pad = out_pad - nc_pad

    # bf16 x: single-pass MXU and half the x HBM/VMEM traffic.
    x_lo = x.astype(w_fused.dtype)

    # Pad rows only to a multiple of 8 sublanes (<= 7 extra zero rows; not a
    # full tile-sized pad copy).  Padded rows are sliced off below.
    n_pad = max(8, _round_up(n, 8))
    if n_pad != n:
        x_lo = jnp.pad(x_lo, ((0, n_pad - n), (0, 0)))

    tm = _choose_tm(n_pad, tm_max)
    grid = (n_pad // tm,)

    x_bytes = x_lo.dtype.itemsize
    w_bytes = w_fused.dtype.itemsize
    cost = pl.CostEstimate(
        flops=2 * n_pad * c * out_pad,
        transcendentals=0,
        bytes_accessed=(n_pad * c * x_bytes + c * out_pad * w_bytes
                        + out_pad * 4 + n_pad * out_pad * 4),
    )

    cls_out, bbox_out = pl.pallas_call(
        _predictor_kernel,
        out_shape=(
            jax.ShapeDtypeStruct((n_pad, nc_pad), jnp.float32),
            jax.ShapeDtypeStruct((n_pad, nb_pad), jnp.float32),
        ),
        grid=grid,
        in_specs=[
            pl.BlockSpec((tm, c), lambda i: (i, 0)),        # x: pipelined row tiles
            pl.BlockSpec((c, out_pad), lambda i: (0, 0)),   # fused W: VMEM-resident
            pl.BlockSpec((1, out_pad), lambda i: (0, 0)),   # fused b: VMEM-resident
        ],
        out_specs=(
            pl.BlockSpec((tm, nc_pad), lambda i: (i, 0)),   # lane-dense cls tiles
            pl.BlockSpec((tm, nb_pad), lambda i: (i, 0)),   # lane-dense bbox tiles
        ),
        compiler_params=pltpu.CompilerParams(
            dimension_semantics=("parallel",),              # v7x: shard row tiles on 2 TCs
            vmem_limit_bytes=48 * 1024 * 1024,
        ),
        cost_estimate=cost,
    )(x_lo, w_fused, b_fused)

    if return_padded:
        return cls_out, bbox_out
    return cls_out[:n, :nc], bbox_out[:n, :nb]


def fast_rcnn_predictor(x, w_cls, b_cls, w_bbox, b_bbox, *, tm_max=512):
    """Convenience one-shot wrapper.  In a real model, call
    prepare_fused_params() ONCE at parameter-load time and reuse its outputs so
    the fusion/padding is never re-materialized on the per-call path."""
    w_fused, b_fused, nc, nb = prepare_fused_params(w_cls, b_cls, w_bbox, b_bbox)
    return fast_rcnn_predictor_fused(x, w_fused, b_fused, nc, nb, tm_max=tm_max)


def init_params(key, in_channels, num_classes, cls_agnostic_bbox_reg=False):
    """Deterministic synthetic init mirroring the module's __init__
    (EMBEDDING_INIT=False path)."""
    num_bbox_reg_classes = 2 if cls_agnostic_bbox_reg else num_classes
    k_bbox, k_cls = jax.random.split(key)
    # PyTorch stores Linear weight as (out, in); we keep the transposed (in, out).
    w_bbox = 0.001 * jax.random.normal(
        k_bbox, (in_channels, num_bbox_reg_classes * 4), dtype=jnp.float32)
    b_bbox = jnp.zeros((num_bbox_reg_classes * 4,), dtype=jnp.float32)
    w_cls = 0.01 * jax.random.normal(
        k_cls, (in_channels, num_classes), dtype=jnp.float32)
    b_cls = jnp.zeros((num_classes,), dtype=jnp.float32)
    return w_cls, b_cls, w_bbox, b_bbox


if __name__ == "__main__":
    # Small shapes consistent with the forward pass: x is (num_rois, in_channels).
    num_rois = 8
    in_channels = 64
    num_classes = 16

    key = jax.random.PRNGKey(0)
    k_x, k_p = jax.random.split(key)
    x = jax.random.normal(k_x, (num_rois, in_channels), dtype=jnp.float32)
    w_cls, b_cls, w_bbox, b_bbox = init_params(k_p, in_channels, num_classes)

    # Parameter fusion is hoisted: done once, reused for every forward call.
    w_fused, b_fused, nc, nb = prepare_fused_params(w_cls, b_cls, w_bbox, b_bbox)

    cls_logit, bbox_pred = fast_rcnn_predictor_fused(x, w_fused, b_fused, nc, nb)
    jax.block_until_ready((cls_logit, bbox_pred))

    assert cls_logit.shape == (num_rois, num_classes)
    assert bbox_pred.shape == (num_rois, num_classes * 4)

    # Tight check against a plain-JAX bf16-input / f32-accumulate reference
    # (same numerics as the kernel's MXU path).
    x_bf = x.astype(jnp.bfloat16)
    cls_ref_bf = jnp.dot(x_bf, w_cls.astype(jnp.bfloat16),
                         preferred_element_type=jnp.float32) + b_cls
    bbox_ref_bf = jnp.dot(x_bf, w_bbox.astype(jnp.bfloat16),
                          preferred_element_type=jnp.float32) + b_bbox
    assert jnp.allclose(cls_logit, cls_ref_bf, rtol=1e-3, atol=1e-3)
    assert jnp.allclose(bbox_pred, bbox_ref_bf, rtol=1e-3, atol=1e-3)

    # Loose check against the full-f32 PyTorch-equivalent forward (bf16 input
    # rounding introduces ~0.4% relative error; accumulation stays f32).
    cls_ref_f32 = x @ w_cls + b_cls
    bbox_ref_f32 = x @ w_bbox + b_bbox
    assert jnp.allclose(cls_logit, cls_ref_f32, rtol=5e-2, atol=5e-3)
    assert jnp.allclose(bbox_pred, bbox_ref_f32, rtol=5e-2, atol=5e-3)

    print("KERNEL_OK")
</pallas_src>

<mosaic_0001>
module attributes {stable_mosaic.version = 11 : i64} {
  func.func @_predictor_kernel(%arg0: i32, %arg1: memref<8x64xbf16, #tpu.memory_space<vmem>>, %arg2: memref<64x256xbf16, #tpu.memory_space<vmem>>, %arg3: memref<1x256xf32, #tpu.memory_space<vmem>>, %arg4: memref<8x128xf32, #tpu.memory_space<vmem>>, %arg5: memref<8x128xf32, #tpu.memory_space<vmem>>) attributes {dimension_semantics = [#tpu.dimension_semantics<parallel>], iteration_bounds = array<i64: 1>, scalar_prefetch = 0 : i64, scratch_operands = 0 : i64, tpu.core_type = #tpu.core_type<tc>, window_params = [{transform_indices = @transform_0, window_bounds = array<i64: 8, 64>}, {pipeline_mode = #tpu.pipeline_mode<synchronous>, transform_indices = @transform_1, window_bounds = array<i64: 64, 256>}, {pipeline_mode = #tpu.pipeline_mode<synchronous>, transform_indices = @transform_2, window_bounds = array<i64: 1, 256>}, {transform_indices = @transform_3, window_bounds = array<i64: 8, 128>}, {transform_indices = @transform_4, window_bounds = array<i64: 8, 128>}]} {
    %c0 = arith.constant 0 : index
    %c0_0 = arith.constant 0 : index
    %0 = vector.load %arg1[%c0, %c0_0] : memref<8x64xbf16, #tpu.memory_space<vmem>>, vector<8x64xbf16>
    %c0_1 = arith.constant 0 : index
    %c0_2 = arith.constant 0 : index
    %1 = vector.load %arg2[%c0_1, %c0_2] : memref<64x256xbf16, #tpu.memory_space<vmem>>, vector<64x256xbf16>
    %cst = arith.constant dense<0.000000e+00> : vector<8x256xf32>
    %2 = tpu.matmul %0, %1, %cst {dimension_numbers = #tpu.dot_dimension_numbers<[1], [0], [0], [1], [0, 0, 1, 1], [], []>} : vector<8x64xbf16>, vector<64x256xbf16>, vector<8x256xf32> -> vector<8x256xf32>
    %c0_3 = arith.constant 0 : index
    %c0_4 = arith.constant 0 : index
    %3 = vector.load %arg3[%c0_3, %c0_4] : memref<1x256xf32, #tpu.memory_space<vmem>>, vector<1x256xf32>
    %4 = vector.broadcast %3 : vector<1x256xf32> to vector<8x256xf32>
    %5 = arith.addf %2, %4 : vector<8x256xf32>
    %6 = vector.extract_strided_slice %5 {offsets = [0, 0], sizes = [8, 128], strides = [1, 1]} : vector<8x256xf32> to vector<8x128xf32>
    %c0_5 = arith.constant 0 : index
    %c0_6 = arith.constant 0 : index
    %7 = vector.load %arg4[%c0_5, %c0_6] : memref<8x128xf32, #tpu.memory_space<vmem>>, vector<8x128xf32>
    tpu.vector_store %arg4[%c0_5, %c0_6], %6 {strides = array<i32>} : memref<8x128xf32, #tpu.memory_space<vmem>>, vector<8x128xf32>,
    %8 = vector.extract_strided_slice %5 {offsets = [0, 128], sizes = [8, 128], strides = [1, 1]} : vector<8x256xf32> to vector<8x128xf32>
    %c0_7 = arith.constant 0 : index
    %c0_8 = arith.constant 0 : index
    %9 = vector.load %arg5[%c0_7, %c0_8] : memref<8x128xf32, #tpu.memory_space<vmem>>, vector<8x128xf32>
    tpu.vector_store %arg5[%c0_7, %c0_8], %8 {strides = array<i32>} : memref<8x128xf32, #tpu.memory_space<vmem>>, vector<8x128xf32>,
    return
  }
  func.func @transform_0(%arg0: i32) -> (i32, i32) {
    %c0_i32 = arith.constant 0 : i32
    %c0_i32_0 = arith.constant 0 : i32
    return %arg0, %c0_i32 : i32, i32
  }
  func.func @transform_1(%arg0: i32) -> (i32, i32) {
    %c0_i32 = arith.constant 0 : i32
    %c0_i32_0 = arith.constant 0 : i32
    %c0_i32_1 = arith.constant 0 : i32
    return %c0_i32, %c0_i32_0 : i32, i32
  }
  func.func @transform_2(%arg0: i32) -> (i32, i32) {
    %c0_i32 = arith.constant 0 : i32
    %c0_i32_0 = arith.constant 0 : i32
    %c0_i32_1 = arith.constant 0 : i32
    return %c0_i32, %c0_i32_0 : i32, i32
  }
  func.func @transform_3(%arg0: i32) -> (i32, i32) {
    %c0_i32 = arith.constant 0 : i32
    %c0_i32_0 = arith.constant 0 : i32
    return %arg0, %c0_i32 : i32, i32
  }
  func.func @transform_4(%arg0: i32) -> (i32, i32) {
    %c0_i32 = arith.constant 0 : i32
    %c0_i32_0 = arith.constant 0 : i32
    return %arg0, %c0_i32 : i32, i32
  }
}

</mosaic_0001>

<bundles_post_ra>
// kernel: tpu_custom_call.1
= control target key start
LH: loop header
LB: loop body
LE: loop exit
PB: predicated region body
PF: predicated region fallthrough
CT: control target
= control target key end

     0   :  { %10 = vsyncpa [#allocation3], 0  ;;  %s404_s0 = inlined_call_operand.hbm [shape: bf16[8,64], index: 0, kind: input, shape index: {}]   ;;  %s405_s1 = inlined_call_operand.hbm [shape: bf16[64,256], index: 1, kind: input, shape index: {}]   ;;  %s406_s2 = inlined_call_operand.vmem [shape: f32[1,256], index: 2, kind: input, shape index: {}]   ;;  %s407_s3 = inlined_call_operand.hbm [shape: f32[8,128], index: 3, kind: output, shape index: {0}]   ;;  %s408_s4 = inlined_call_operand.hbm [shape: f32[8,128], index: 4, kind: output, shape index: {1}]  }
   0x1   :  { %11 = vsyncpa [#allocation6], 0 }
   0x2   :  { %12 = vsyncpa [#allocation4], 0 }
   0x3   :  { %13 = vsyncpa [#allocation9], 0  ;;  %s307_s15 = smov [#allocation2]   ;;  %s308_s17 = smov [#allocation5]  }
   0x4   :  { %s20_s16 = sshll.u32 %s307_s15, 4  ;;  %s29_s18 = sshll.u32 %s308_s17, 4  ;;  %s21_s16 = int_to_ptr.vmem [resolvable:$true] %s20_s16  ;;  %s339_s18 = int_to_ptr.vmem [resolvable:$true] %s29_s18 }
   0x5   :  { %s211_s21 = scalar_lea.hbm %s404_s0, 64 }
   0x6   :  { %p212_p0 = scmp.ne.s32.totalorder %s404_s0, %s211_s21  ;;  %p215_p1 = scmp.lt.u32.totalorder %s211_s21, %s404_s0 }
   0x8   :  { %p217_p2 = pnand %p215_p1, %p212_p0 }
   0xa   :  { %220 = shalt.err (!%p217_p2)
}
   0xb   :  { %s221_s26 = scalar_lea.vmem %s21_s16, 64  ;;  %p226_p4 = scmp.lt.s32.totalorder %s21_s16, %s21_s16 }
   0xc   :  { %p222_p3 = scmp.ne.s32.totalorder %s21_s16, %s221_s26  ;;  %p227_p5 = scmp.lt.s32.totalorder %s221_s26, %s221_s26 }
   0xe   :  { %p228_p6 = por %p227_p5, %p226_p4 }
  0x10   :  { %p229_p7 = pnand %p228_p6, %p222_p3 }
  0x12   :  { %232 = shalt.err (!%p229_p7)
}
  0x13   :  { %23 = dma.hbm_to_vmem [thread:$0]  %s404_s0, 64, %s21_s16, [#allocation3]  }
  0x14   :  { %s233_s5 = scalar_lea.hbm %s405_s1, 1024 }
  0x15   :  { %p234_p8 = scmp.ne.s32.totalorder %s405_s1, %s233_s5  ;;  %p237_p9 = scmp.lt.u32.totalorder %s233_s5, %s405_s1 }
  0x17   :  { %p239_p10 = pnand %p237_p9, %p234_p8 }
  0x19   :  { %242 = shalt.err (!%p239_p10)
}
  0x1a   :  { %s243_s10 = scalar_lea.vmem %s339_s18, 1024  ;;  %p248_p12 = scmp.lt.s32.totalorder %s339_s18, %s339_s18 }
  0x1b   :  { %p244_p11 = scmp.ne.s32.totalorder %s339_s18, %s243_s10  ;;  %p249_p13 = scmp.lt.s32.totalorder %s243_s10, %s243_s10 }
  0x1d   :  { %p250_p0 = por %p249_p13, %p248_p12 }
  0x1f   :  { %p251_p1 = pnand %p250_p0, %p244_p11 }
  0x21   :  { %254 = shalt.err (!%p251_p1)
}
  0x22   :  { %s309_s0 = smov 128   ;;  %s310_s11 = smov 8  }
  0x23   :  { %35 = dma.hbm_to_vmem [thread:$0]  %s405_s1, 1024, %s339_s18, [#allocation6], %s309_s0, %s309_s0, %s310_s11  }
  0x24   :  { %299 = dma.done.wait [#allocation3], 64  }
  0x25   :  { %300 = vsyncadd [#allocation3], 4294967232 }
  0x26   :  { %301 = dma.done.wait [#allocation6], 1024  }
  0x27   :  { %302 = vsyncadd [#allocation6], 4294966272  ;;  %v311_v0 = vmov 0   ;;  %v199_v1 = vld [vmem:[#allocation5 + $0x4] ss:$8 sps:$4 sm:$0xff]   ;;  %vm106_vm0 = vcmask 523264   ;;  %v56_v10 = vlaneseq }
  0x28   :  { %142 = vmatprep.mubr.bf16.mxu0 %v311_v0  ;;  %v201_v2 = vld [vmem:[#allocation5] ss:$8 sps:$4 sm:$0xff]   ;;  %110 = vmatprep.subr.bf16.mxu0 %v199_v1  ;;  %v202_v3 = vld [vmem:[#allocation5 + $0x14] ss:$8 sps:$4 sm:$0xff]   ;;  %v204_v4 = vld [vmem:[#allocation5 + $0x10] ss:$8 sps:$4 sm:$0xff]  }
  0x29   :  { %111 = vmatpush1.bf16.msra.mxu0 %v201_v2  ;;  %v205_v5 = vld [vmem:[#allocation5 + $0x24] ss:$8 sps:$4 sm:$0xff]   ;;  %v207_v6 = vld [vmem:[#allocation5 + $0x20] ss:$8 sps:$4 sm:$0xff]   ;;  %v208_v7 = vld [vmem:[#allocation5 + $0x34] ss:$8 sps:$4 sm:$0xff]  }
  0x2a   :  { %112 = vmatprep.subr.bf16.mxu0 %v202_v3  ;;  %v210_v8 = vld [vmem:[#allocation5 + $0x30] ss:$8 sps:$4 sm:$0xff]   ;;  %v45_v9 = vld [vmem:[#allocation2] sm:$0xf]  ;;  %v57_v11 = vshrl.u32 %v56_v10, 7  ;;  %s312_s15 = smov [#allocation7]  }
  0x2b   :  { %v54_v13 = vld [vmem:[%s406_s2] sm:$0x3]  ;;  %s159_s16 = sshll.u32 %s312_s15, 4  ;;  %s313_s17 = smov [#allocation8]   ;;  %s160_s16 = int_to_ptr.vmem [resolvable:$true] %s159_s16 }
  0x2c   :  { %v58_v12 = vsub.s32 0, %v57_v11  ;;  %v62_v14 = vsub.s32 1, %v57_v11  ;;  %s169_s18 = sshll.u32 %s313_s17, 4  ;;  %s255_s19 = scalar_lea.vmem %s160_s16, 128  ;;  %s373_s18 = int_to_ptr.vmem [resolvable:$true] %s169_s18 }
  0x2d   :  { %113 = vmatpush1.bf16.msra.mxu0 %v204_v4  ;;  %p256_p2 = scmp.ne.s32.totalorder %s160_s16, %s255_s19  ;;  %p260_p3 = scmp.lt.s32.totalorder %s160_s16, %s160_s16 }
  0x2e   :  { %114 = vmatprep.subr.bf16.mxu0 %v205_v5  ;;  %v59_v15 = vrot.slane %v54_v13, %v58_v12  ;;  %v63_v16 = vrot.slane %v54_v13, %v62_v14  ;;  %p261_p4 = scmp.lt.s32.totalorder %s255_s19, %s255_s19 }
  0x30   :  { %p262_p5 = por %p261_p4, %p260_p3 }
  0x31   :  { %115 = vmatpush1.bf16.msra.mxu0 %v207_v6 }
  0x32   :  { %116 = vmatprep.subr.bf16.mxu0 %v208_v7  ;;  %p263_p6 = pnand %p262_p5, %p256_p2 }
  0x35   :  { %117 = vmatpush1.bf16.msra.mxu0 %v210_v8 }
  0x38   :  { %191 = vmatmul.mubr.msk.bf16.vlgmr.msra.gmra.mrb[0].mxu0 %vm106_vm0, %v45_v9 }
 0x10b   :  { %v144_v17 = vpop.f32.mrb[0].mxu0 }
 0x10c   :  { %v145_v18 = vadd.f32 %v144_v17, %v59_v15  ;;  %v146_v19 = vpop.f32.mrb[1].mxu0 }
 0x10d   :  { %v147_v20 = vadd.f32 %v146_v19, %v63_v16  ;;  %v148_v21 = vpop.f32.mrb[2].mxu0 }
 0x10e   :  { %151 = vst [vmem:[#allocation7] sm:$0xff] %v145_v18  ;;  %v149_v22 = vpop.f32.mrb[3].mxu0 }
 0x10f   :  { %152 = vst [vmem:[#allocation8] sm:$0xff] %v147_v20 }
 0x110   :  { %266 = shalt.err (!%p263_p6)
}
 0x111   :  { %s267_s21 = scalar_lea.hbm %s407_s3, 128 }
 0x112   :  { %p268_p7 = scmp.ne.s32.totalorder %s407_s3, %s267_s21  ;;  %p271_p8 = scmp.lt.u32.totalorder %s267_s21, %s407_s3 }
 0x114   :  { %p273_p9 = pnand %p271_p8, %p268_p7 }
 0x116   :  { %276 = shalt.err (!%p273_p9)
}
 0x117   :  { %162 = dma.vmem_to_hbm [thread:$0]  %s160_s16, 128, %s407_s3, [#allocation4]  }
 0x118   :  { %s277_s28 = scalar_lea.vmem %s373_s18, 128  ;;  %p282_p11 = scmp.lt.s32.totalorder %s373_s18, %s373_s18 }
 0x119   :  { %p278_p10 = scmp.ne.s32.totalorder %s373_s18, %s277_s28  ;;  %p283_p12 = scmp.lt.s32.totalorder %s277_s28, %s277_s28 }
 0x11b   :  { %p284_p13 = por %p283_p12, %p282_p11 }
 0x11d   :  { %p285_p0 = pnand %p284_p13, %p278_p10 }
 0x11f   :  { %288 = shalt.err (!%p285_p0)
}
 0x120   :  { %s289_s5 = scalar_lea.hbm %s408_s4, 128 }
 0x121   :  { %p290_p1 = scmp.ne.s32.totalorder %s408_s4, %s289_s5  ;;  %p293_p2 = scmp.lt.u32.totalorder %s289_s5, %s408_s4 }
 0x123   :  { %p295_p3 = pnand %p293_p2, %p290_p1 }
 0x125   :  { %298 = shalt.err (!%p295_p3)
}
 0x126   :  { %172 = dma.vmem_to_hbm [thread:$0]  %s373_s18, 128, %s408_s4, [#allocation9]  }
 0x127   :  { %303 = dma.done.wait [#allocation4], 128  }
 0x128   :  { %304 = vsyncadd [#allocation4], 4294967168 }
 0x129   :  { %305 = dma.done.wait [#allocation9], 128  }
 0x12a   :  { %306 = vsyncadd [#allocation9], 4294967168 }
 0x12b   :  { %179 = vsyncpa [#allocation3], 1 }
 0x12c   :  { %180 = vsyncpa [#allocation6], 1 }
 0x12d   :  { %181 = vsyncpa [#allocation4], 1 }
 0x12e   :  { %182 = vsyncpa [#allocation9], 1 }

</bundles_post_ra>
